<compile_context>
chip_gen: v5e
topology: v5e:2x2
jax: 0.10.0
libtpu: 0.0.40
codegen_flags: <defaults>
</compile_context>

<pallas_src>
import math

import jax
import jax.numpy as jnp
from jax.experimental import pallas as pl
from jax.experimental.pallas import tpu as pltpu


# -----------------------------------------------------------------------------
# Kernel
# -----------------------------------------------------------------------------
def _make_fused_kernel(n_layers: int):
    """Fused-MLP kernel body: x @ W0 + b0 -> relu -> ... -> x @ W_{L-1} + b_{L-1}.

    The diff/prior streams and the final `diff + scale*prior` combine are
    already folded into the fused (W, b) stack host-side, so the kernel is a
    plain MLP chain with a lane-dense final store.
    """

    def kernel(x_ref, *refs):
        out_ref = refs[-1]
        param_refs = refs[:-1]  # w0, b0, w1, b1, ..., w_{L-1}, b_{L-1}

        y = x_ref[...]  # already f32
        for i in range(n_layers):
            w = param_refs[2 * i][...]
            b = param_refs[2 * i + 1][...]
            y = jnp.dot(y, w, preferred_element_type=jnp.float32) + b
            if i < n_layers - 1:  # ReLU on all but the last layer
                y = jnp.maximum(y, 0.0)

        out_ref[...] = y.astype(out_ref.dtype)

    return kernel


# -----------------------------------------------------------------------------
# Host-side parameter fusion
# -----------------------------------------------------------------------------
def _round_up(n: int, m: int) -> int:
    return -(-n // m) * m


def _pack_fused_params(diff_params, prior_params, scale):
    """Fuse the two MLP stacks (and the scale & final add) into one stack.

    Returns (fused_params, out_padded) where out_padded is the zero-padded
    output width of the last fused layer (multiple of 128).
    """
    n_layers = len(diff_params)
    assert len(prior_params) == n_layers and n_layers >= 1
    out_dim = diff_params[-1][0].shape[1]
    out_padded = max(128, _round_up(out_dim, 128))
    scale = jnp.float32(scale)

    fused = []
    for i in range(n_layers):
        wd, bd = diff_params[i]
        wp, bp = prior_params[i]
        assert wd.shape == wp.shape and bd.shape == bp.shape
        wd = wd.astype(jnp.float32)
        wp = wp.astype(jnp.float32)
        bd = bd.astype(jnp.float32)
        bp = bp.astype(jnp.float32)

        first = i == 0
        last = i == n_layers - 1

        if last:
            # Fold the output scale into the (frozen) prior stream's last layer:
            #   scale * (h @ Wp + bp) == h @ (scale*Wp) + scale*bp   (exact, linear)
            wp = scale * wp
            bp = scale * bp

        if first and last:
            # Single Linear layer: y = x @ (Wd + s*Wp) + (bd + s*bp)
            w = wd + wp
            b = bd + bp
        elif first:
            # x is shared by both streams: horizontal concat.
            w = jnp.concatenate([wd, wp], axis=1)
            b = jnp.concatenate([bd, bp], axis=1)
        elif last:
            # Combine fold: [h_diff | h_prior] @ [Wd ; s*Wp] + (bd + s*bp)
            #             == h_diff @ Wd + s * h_prior @ Wp + bd + s*bp
            w = jnp.concatenate([wd, wp], axis=0)
            b = bd + bp
        else:
            # Block-diagonal: exact-zero off-diagonal blocks keep the two
            # streams independent.
            zdp = jnp.zeros((wd.shape[0], wp.shape[1]), dtype=jnp.float32)
            zpd = jnp.zeros((wp.shape[0], wd.shape[1]), dtype=jnp.float32)
            w = jnp.block([[wd, zdp], [zpd, wp]])
            b = jnp.concatenate([bd, bp], axis=1)

        if last:
            # Zero-pad output columns to a lane-tile multiple -> lane-dense store.
            pad = out_padded - w.shape[1]
            if pad:
                w = jnp.pad(w, ((0, 0), (0, pad)))
                b = jnp.pad(b, ((0, 0), (0, pad)))

        fused.append((w, b))

    return fused, out_padded


# -----------------------------------------------------------------------------
# Forward wrapper
# -----------------------------------------------------------------------------
def dqn_with_prior_forward(x, diff_params, prior_params, scale=5.0,
                           max_batch_tile=256):
    """Fused DQNWithPrior forward.

    x            : (B, dims[0]) float32
    diff_params  : list of (W_i, b_i), W_i: (dims[i], dims[i+1]),
                   b_i: (1, dims[i+1])
    prior_params : same structure
    """
    n_layers = len(diff_params)
    batch, in_dim = x.shape
    out_dim = diff_params[-1][0].shape[1]

    fused_params, out_padded = _pack_fused_params(diff_params, prior_params,
                                                  scale)

    # --- batch tiling: pad to sublane multiple, tile for large batches -------
    padded8 = max(8, _round_up(batch, 8))
    if padded8 <= max_batch_tile:
        tb = padded8
        batch_padded = padded8
    else:
        tb = max_batch_tile                      # multiple of 8
        batch_padded = _round_up(batch, tb)
    if batch_padded != batch:
        x = jnp.pad(x, ((0, batch_padded - batch), (0, 0)))
    x = x.astype(jnp.float32)
    grid = (batch_padded // tb,)

    # --- specs ---------------------------------------------------------------
    # x / out stream per batch tile; fused weights & biases are full-array
    # blocks with constant index maps (stay VMEM-resident across the grid).
    x_spec = pl.BlockSpec((tb, in_dim), lambda i: (i, 0))
    param_specs = []
    flat_params = []
    for (w, b) in fused_params:
        param_specs.append(pl.BlockSpec(w.shape, lambda i: (0, 0)))
        param_specs.append(pl.BlockSpec(b.shape, lambda i: (0, 0)))
        flat_params.extend([w, b])
    out_spec = pl.BlockSpec((tb, out_padded), lambda i: (i, 0))

    # --- cost estimate (helps XLA schedule this call inside larger graphs) ---
    flops = sum(2 * batch_padded * w.shape[0] * w.shape[1]
                for (w, _) in fused_params)
    bytes_accessed = 4 * (x.size
                          + sum(w.size + b.size for (w, b) in fused_params)
                          + batch_padded * out_padded)
    cost = pl.CostEstimate(flops=flops, transcendentals=0,
                           bytes_accessed=bytes_accessed)

    kernel = _make_fused_kernel(n_layers)

    # NOTE: for much larger hidden widths (>=2048) the fused weights should be
    # K/N-tiled (or vmem_limit_bytes raised) instead of loaded as full blocks;
    # at these sizes (<0.25 MiB total) everything comfortably fits in VMEM.
    out = pl.pallas_call(
        kernel,
        out_shape=jax.ShapeDtypeStruct((batch_padded, out_padded), jnp.float32),
        grid_spec=pltpu.PrefetchScalarGridSpec(
            num_scalar_prefetch=0,
            grid=grid,
            in_specs=[x_spec] + param_specs,
            out_specs=out_spec,
        ),
        compiler_params=pltpu.CompilerParams(
            dimension_semantics=("parallel",)),
        cost_estimate=cost,
    )(x, *flat_params)

    return out[:batch, :out_dim]


# -----------------------------------------------------------------------------
# Init helpers (match MLP.initialize: xavier_uniform weights, bias = 0.01)
# -----------------------------------------------------------------------------
def xavier_uniform(key, fan_in, fan_out, dtype=jnp.float32):
    limit = math.sqrt(6.0 / (fan_in + fan_out))
    return jax.random.uniform(key, (fan_in, fan_out), dtype=dtype,
                              minval=-limit, maxval=limit)


def init_mlp_params(key, dimensions):
    params = []
    for i in range(len(dimensions) - 1):
        key, wk = jax.random.split(key)
        w = xavier_uniform(wk, dimensions[i], dimensions[i + 1])
        b = jnp.full((1, dimensions[i + 1]), 0.01, dtype=jnp.float32)
        params.append((w, b))
    return params, key


def reference_forward(x, diff_params, prior_params, scale):
    """Pure-JAX reference (unfused) for correctness checking."""

    def mlp(x, params):
        for i, (w, b) in enumerate(params):
            x = x @ w + b
            if i < len(params) - 1:
                x = jnp.maximum(x, 0.0)
        return x

    return mlp(x, diff_params) + scale * mlp(x, prior_params)


# -----------------------------------------------------------------------------
if __name__ == "__main__":
    key = jax.random.PRNGKey(0)

    # Small shapes consistent with the module: state_dim=32, hidden=64, 8 actions.
    dimensions = [32, 64, 64, 8]
    batch = 2
    scale = 5.0

    diff_params, key = init_mlp_params(key, dimensions)
    prior_params, key = init_mlp_params(key, dimensions)

    key, xk = jax.random.split(key)
    x = jax.random.normal(xk, (batch, dimensions[0]), dtype=jnp.float32)

    y = dqn_with_prior_forward(x, diff_params, prior_params, scale=scale)
    y = jax.block_until_ready(y)

    y_ref = reference_forward(x, diff_params, prior_params, scale)
    assert y.shape == (batch, dimensions[-1])
    assert jnp.allclose(y, y_ref, atol=1e-3, rtol=1e-3), "mismatch vs reference"

    # Also exercise a larger batch (multi-tile grid + padding slice).
    key, xk2 = jax.random.split(key)
    x_big = jax.random.normal(xk2, (300, dimensions[0]), dtype=jnp.float32)
    y_big = jax.block_until_ready(
        dqn_with_prior_forward(x_big, diff_params, prior_params, scale=scale))
    y_big_ref = reference_forward(x_big, diff_params, prior_params, scale)
    assert y_big.shape == (300, dimensions[-1])
    assert jnp.allclose(y_big, y_big_ref, atol=1e-3, rtol=1e-3), \
        "big-batch mismatch"

    print("KERNEL_OK")
</pallas_src>

<mosaic_0001>
module attributes {stable_mosaic.version = 11 : i64} {
  func.func @kernel(%arg0: i32, %arg1: memref<8x32xf32, #tpu.memory_space<vmem>>, %arg2: memref<32x128xf32, #tpu.memory_space<vmem>>, %arg3: memref<1x128xf32, #tpu.memory_space<vmem>>, %arg4: memref<128x128xf32, #tpu.memory_space<vmem>>, %arg5: memref<1x128xf32, #tpu.memory_space<vmem>>, %arg6: memref<128x128xf32, #tpu.memory_space<vmem>>, %arg7: memref<1x128xf32, #tpu.memory_space<vmem>>, %arg8: memref<8x128xf32, #tpu.memory_space<vmem>>) attributes {dimension_semantics = [#tpu.dimension_semantics<parallel>], iteration_bounds = array<i64: 1>, scalar_prefetch = 0 : i64, scratch_operands = 0 : i64, tpu.core_type = #tpu.core_type<tc>, window_params = [{transform_indices = @transform_0, window_bounds = array<i64: 8, 32>}, {pipeline_mode = #tpu.pipeline_mode<synchronous>, transform_indices = @transform_1, window_bounds = array<i64: 32, 128>}, {pipeline_mode = #tpu.pipeline_mode<synchronous>, transform_indices = @transform_2, window_bounds = array<i64: 1, 128>}, {pipeline_mode = #tpu.pipeline_mode<synchronous>, transform_indices = @transform_3, window_bounds = array<i64: 128, 128>}, {pipeline_mode = #tpu.pipeline_mode<synchronous>, transform_indices = @transform_4, window_bounds = array<i64: 1, 128>}, {pipeline_mode = #tpu.pipeline_mode<synchronous>, transform_indices = @transform_5, window_bounds = array<i64: 128, 128>}, {pipeline_mode = #tpu.pipeline_mode<synchronous>, transform_indices = @transform_6, window_bounds = array<i64: 1, 128>}, {transform_indices = @transform_7, window_bounds = array<i64: 8, 128>}]} {
    %c0 = arith.constant 0 : index
    %c0_0 = arith.constant 0 : index
    %0 = vector.load %arg1[%c0, %c0_0] : memref<8x32xf32, #tpu.memory_space<vmem>>, vector<8x32xf32>
    %c0_1 = arith.constant 0 : index
    %c0_2 = arith.constant 0 : index
    %1 = vector.load %arg2[%c0_1, %c0_2] : memref<32x128xf32, #tpu.memory_space<vmem>>, vector<32x128xf32>
    %c0_3 = arith.constant 0 : index
    %c0_4 = arith.constant 0 : index
    %2 = vector.load %arg3[%c0_3, %c0_4] : memref<1x128xf32, #tpu.memory_space<vmem>>, vector<1x128xf32>
    %cst = arith.constant dense<0.000000e+00> : vector<8x128xf32>
    %3 = tpu.matmul %0, %1, %cst {dimension_numbers = #tpu.dot_dimension_numbers<[1], [0], [0], [1], [0, 0, 1, 1], [], []>} : vector<8x32xf32>, vector<32x128xf32>, vector<8x128xf32> -> vector<8x128xf32>
    %4 = vector.broadcast %2 : vector<1x128xf32> to vector<8x128xf32>
    %5 = arith.addf %3, %4 : vector<8x128xf32>
    %cst_5 = arith.constant 0.000000e+00 : f32
    %6 = vector.broadcast %cst_5 : f32 to vector<8x128xf32>
    %7 = arith.maximumf %5, %6 : vector<8x128xf32>
    %c0_6 = arith.constant 0 : index
    %c0_7 = arith.constant 0 : index
    %8 = vector.load %arg4[%c0_6, %c0_7] : memref<128x128xf32, #tpu.memory_space<vmem>>, vector<128x128xf32>
    %c0_8 = arith.constant 0 : index
    %c0_9 = arith.constant 0 : index
    %9 = vector.load %arg5[%c0_8, %c0_9] : memref<1x128xf32, #tpu.memory_space<vmem>>, vector<1x128xf32>
    %cst_10 = arith.constant dense<0.000000e+00> : vector<8x128xf32>
    %10 = tpu.matmul %7, %8, %cst_10 {dimension_numbers = #tpu.dot_dimension_numbers<[1], [0], [0], [1], [0, 0, 1, 1], [], []>} : vector<8x128xf32>, vector<128x128xf32>, vector<8x128xf32> -> vector<8x128xf32>
    %11 = vector.broadcast %9 : vector<1x128xf32> to vector<8x128xf32>
    %12 = arith.addf %10, %11 : vector<8x128xf32>
    %cst_11 = arith.constant 0.000000e+00 : f32
    %13 = vector.broadcast %cst_11 : f32 to vector<8x128xf32>
    %14 = arith.maximumf %12, %13 : vector<8x128xf32>
    %c0_12 = arith.constant 0 : index
    %c0_13 = arith.constant 0 : index
    %15 = vector.load %arg6[%c0_12, %c0_13] : memref<128x128xf32, #tpu.memory_space<vmem>>, vector<128x128xf32>
    %c0_14 = arith.constant 0 : index
    %c0_15 = arith.constant 0 : index
    %16 = vector.load %arg7[%c0_14, %c0_15] : memref<1x128xf32, #tpu.memory_space<vmem>>, vector<1x128xf32>
    %cst_16 = arith.constant dense<0.000000e+00> : vector<8x128xf32>
    %17 = tpu.matmul %14, %15, %cst_16 {dimension_numbers = #tpu.dot_dimension_numbers<[1], [0], [0], [1], [0, 0, 1, 1], [], []>} : vector<8x128xf32>, vector<128x128xf32>, vector<8x128xf32> -> vector<8x128xf32>
    %18 = vector.broadcast %16 : vector<1x128xf32> to vector<8x128xf32>
    %19 = arith.addf %17, %18 : vector<8x128xf32>
    %c0_17 = arith.constant 0 : index
    %c0_18 = arith.constant 0 : index
    %20 = vector.load %arg8[%c0_17, %c0_18] : memref<8x128xf32, #tpu.memory_space<vmem>>, vector<8x128xf32>
    tpu.vector_store %arg8[%c0_17, %c0_18], %19 {strides = array<i32>} : memref<8x128xf32, #tpu.memory_space<vmem>>, vector<8x128xf32>,
    return
  }
  func.func @transform_0(%arg0: i32) -> (i32, i32) {
    %c0_i32 = arith.constant 0 : i32
    %c0_i32_0 = arith.constant 0 : i32
    return %arg0, %c0_i32 : i32, i32
  }
  func.func @transform_1(%arg0: i32) -> (i32, i32) {
    %c0_i32 = arith.constant 0 : i32
    %c0_i32_0 = arith.constant 0 : i32
    %c0_i32_1 = arith.constant 0 : i32
    return %c0_i32, %c0_i32_0 : i32, i32
  }
  func.func @transform_2(%arg0: i32) -> (i32, i32) {
    %c0_i32 = arith.constant 0 : i32
    %c0_i32_0 = arith.constant 0 : i32
    %c0_i32_1 = arith.constant 0 : i32
    return %c0_i32, %c0_i32_0 : i32, i32
  }
  func.func @transform_3(%arg0: i32) -> (i32, i32) {
    %c0_i32 = arith.constant 0 : i32
    %c0_i32_0 = arith.constant 0 : i32
    %c0_i32_1 = arith.constant 0 : i32
    return %c0_i32, %c0_i32_0 : i32, i32
  }
  func.func @transform_4(%arg0: i32) -> (i32, i32) {
    %c0_i32 = arith.constant 0 : i32
    %c0_i32_0 = arith.constant 0 : i32
    %c0_i32_1 = arith.constant 0 : i32
    return %c0_i32, %c0_i32_0 : i32, i32
  }
  func.func @transform_5(%arg0: i32) -> (i32, i32) {
    %c0_i32 = arith.constant 0 : i32
    %c0_i32_0 = arith.constant 0 : i32
    %c0_i32_1 = arith.constant 0 : i32
    return %c0_i32, %c0_i32_0 : i32, i32
  }
  func.func @transform_6(%arg0: i32) -> (i32, i32) {
    %c0_i32 = arith.constant 0 : i32
    %c0_i32_0 = arith.constant 0 : i32
    %c0_i32_1 = arith.constant 0 : i32
    return %c0_i32, %c0_i32_0 : i32, i32
  }
  func.func @transform_7(%arg0: i32) -> (i32, i32) {
    %c0_i32 = arith.constant 0 : i32
    %c0_i32_0 = arith.constant 0 : i32
    return %arg0, %c0_i32 : i32, i32
  }
}

</mosaic_0001>

<bundles_post_ra>
// kernel: tpu_custom_call.1
= control target key start
LH: loop header
LB: loop body
LE: loop exit
PB: predicated region body
PF: predicated region fallthrough
CT: control target
= control target key end

     0   :  { %12 = vsyncpa [#allocation3], 0  ;;  %s433_s0 = inlined_call_operand.hbm [shape: f32[8,32], index: 0, kind: input, shape index: {}]   ;;  %s434_s1 = inlined_call_operand.hbm [shape: f32[32,128], index: 1, kind: input, shape index: {}]   ;;  %s435_s2 = inlined_call_operand.vmem [shape: f32[1,128], index: 2, kind: input, shape index: {}]   ;;  %s436_s3 = inlined_call_operand.hbm [shape: f32[128,128], index: 3, kind: input, shape index: {}]   ;;  %s437_s4 = inlined_call_operand.vmem [shape: f32[1,128], index: 4, kind: input, shape index: {}]   ;;  %s438_s5 = inlined_call_operand.hbm [shape: f32[128,128], index: 5, kind: input, shape index: {}]   ;;  %s439_s6 = inlined_call_operand.vmem [shape: f32[1,128], index: 6, kind: input, shape index: {}]   ;;  %s440_s7 = inlined_call_operand.hbm [shape: f32[8,128], index: 7, kind: output, shape index: {}]  }
   0x1   :  { %13 = vsyncpa [#allocation6], 0 }
   0x2   :  { %14 = vsyncpa [#allocation9], 0  ;;  %s31_s26 = sshll.u32 %s434_s1, 4  ;;  %s32_s26 = int_to_ptr.hbm [resolvable:$true] %s31_s26 }
   0x3   :  { %15 = vsyncpa [#allocation4], 0  ;;  %s362_s27 = smov [#allocation5]   ;;  %s21_s8 = sshll.u32 %s433_s0, 4  ;;  %s22_s8 = int_to_ptr.hbm [resolvable:$true] %s21_s8 }
   0x4   :  { %s33_s28 = sshll.u32 %s362_s27, 4  ;;  %s363_s9 = smov 128   ;;  %s34_s28 = int_to_ptr.vmem [resolvable:$true] %s33_s28 }
   0x5   :  { %s364_s10 = smov 8   ;;  %s365_s11 = smov [#allocation2]  }
   0x6   :  { %39 = dma.hbm_to_vmem [thread:$0]  %s32_s26, 512, %s34_s28, [#allocation6], %s363_s9, %s363_s9, %s364_s10  }
   0x7   :  { %s23_s12 = sshll.u32 %s365_s11, 4  ;;  %s46_s15 = sshll.u32 %s436_s3, 4  ;;  %s24_s12 = int_to_ptr.vmem [resolvable:$true] %s23_s12  ;;  %s47_s15 = int_to_ptr.hbm [resolvable:$true] %s46_s15 }
   0x8   :  { %26 = dma.hbm_to_vmem [thread:$0]  %s22_s8, 128, %s24_s12, [#allocation3]  }
   0x9   :  { %s61_s17 = sshll.u32 %s438_s5, 4  ;;  %s366_s18 = smov [#allocation7]   ;;  %s62_s17 = int_to_ptr.hbm [resolvable:$true] %s61_s17 }
   0xa   :  { %s48_s19 = sshll.u32 %s366_s18, 4  ;;  %s367_s0 = smov [#allocation8]   ;;  %s49_s19 = int_to_ptr.vmem [resolvable:$true] %s48_s19 }
   0xb   :  { %54 = dma.hbm_to_vmem [thread:$0]  %s47_s15, 2048, %s49_s19, [#allocation6], %s363_s9, %s363_s9, %s364_s10  }
   0xc   :  { %s63_s20 = sshll.u32 %s367_s0, 4  ;;  %s64_s20 = int_to_ptr.vmem [resolvable:$true] %s63_s20 }
   0xd   :  { %69 = dma.hbm_to_vmem [thread:$0]  %s62_s17, 2048, %s64_s20, [#allocation9], %s363_s9, %s363_s9, %s364_s10  }
   0xe   :  { %354 = dma.done.wait [#allocation3], 128  }
   0xf   :  { %355 = vsyncadd [#allocation3], 4294967168 }
  0x10   :  { %356 = dma.done.wait [#allocation6], 2560  }
  0x11   :  { %357 = vsyncadd [#allocation6], 4294964736 }
  0x12   :  { %358 = dma.done.wait [#allocation9], 2048  }
  0x13   :  { %359 = vsyncadd [#allocation9], 4294965248  ;;  %v92_v0 = vld [vmem:[#allocation5 + $0x18] sm:$0xff]  ;;  %v91_v1 = vld [vmem:[#allocation5 + $0x10] sm:$0xff]  ;;  %vm97_vm0 = vcmask 261120   ;;  %s368_s24 = smov [#allocation10]  }
  0x14   :  { %113 = vmatpush.msra.mxu0 %v92_v0  ;;  %v137_v2 = vld [vmem:[#allocation7 + $0x78] sm:$0xff]  ;;  %v90_v3 = vld [vmem:[#allocation5 + $0x8] sm:$0xff]  ;;  %v136_v4 = vld [vmem:[#allocation7 + $0x70] sm:$0xff]  ;;  %s209_s25 = sshll.u32 %s368_s24, 4  ;;  %s211_s28 = sshll.u32 %s440_s7, 4  ;;  %s210_s25 = int_to_ptr.vmem [resolvable:$true] %s209_s25  ;;  %s212_s28 = int_to_ptr.hbm [resolvable:$true] %s211_s28 }
  0x15   :  { %142 = vmatpush.msra.mxu1 %v137_v2  ;;  %v135_v5 = vld [vmem:[#allocation7 + $0x68] sm:$0xff]  ;;  %v89_v6 = vld [vmem:[#allocation5] sm:$0xff]  ;;  %v88_v7 = vld [vmem:[#allocation2] sm:$0xff] }
  0x16   :  { %114 = vmatpush.msra.mxu0 %v91_v1  ;;  %v134_v8 = vld [vmem:[#allocation7 + $0x60] sm:$0xff]  ;;  %v133_v9 = vld [vmem:[#allocation7 + $0x58] sm:$0xff]  ;;  %v132_v10 = vld [vmem:[#allocation7 + $0x50] sm:$0xff] }
  0x17   :  { %143 = vmatpush.msra.mxu1 %v136_v4  ;;  %v131_v11 = vld [vmem:[#allocation7 + $0x48] sm:$0xff]  ;;  %v130_v12 = vld [vmem:[#allocation7 + $0x40] sm:$0xff]  ;;  %v129_v13 = vld [vmem:[#allocation7 + $0x38] sm:$0xff] }
  0x18   :  { %115 = vmatpush.msra.mxu0 %v90_v3  ;;  %v128_v14 = vld [vmem:[#allocation7 + $0x30] sm:$0xff]  ;;  %v127_v15 = vld [vmem:[#allocation7 + $0x28] sm:$0xff]  ;;  %v126_v16 = vld [vmem:[#allocation7 + $0x20] sm:$0xff] }
  0x19   :  { %144 = vmatpush.msra.mxu1 %v135_v5  ;;  %v125_v17 = vld [vmem:[#allocation7 + $0x18] sm:$0xff]  ;;  %v124_v18 = vld [vmem:[#allocation7 + $0x10] sm:$0xff]  ;;  %v123_v19 = vld [vmem:[#allocation7 + $0x8] sm:$0xff] }
  0x1a   :  { %116 = vmatpush.msra.mxu0 %v89_v6  ;;  %v122_v20 = vld [vmem:[#allocation7] sm:$0xff]  ;;  %v178_v21 = vld [vmem:[#allocation8 + $0x78] sm:$0xff]  ;;  %v177_v22 = vld [vmem:[#allocation8 + $0x70] sm:$0xff] }
  0x1b   :  { %223 = vmatmul.msk.f32.vlgmr.msra.gmra.mxu0 %vm97_vm0, %v88_v7  ;;  %145 = vmatpush.msra.mxu1 %v134_v8  ;;  %v176_v23 = vld [vmem:[#allocation8 + $0x68] sm:$0xff]  ;;  %v175_v24 = vld [vmem:[#allocation8 + $0x60] sm:$0xff]  ;;  %v174_v25 = vld [vmem:[#allocation8 + $0x58] sm:$0xff] }
  0x1c   :  { %183 = vmatpush.msra.mxu2 %v178_v21  ;;  %v173_v26 = vld [vmem:[#allocation8 + $0x50] sm:$0xff]  ;;  %v172_v27 = vld [vmem:[#allocation8 + $0x48] sm:$0xff]  ;;  %v171_v28 = vld [vmem:[#allocation8 + $0x40] sm:$0xff] }
  0x1d   :  { %146 = vmatpush.msra.mxu1 %v133_v9  ;;  %v170_v29 = vld [vmem:[#allocation8 + $0x38] sm:$0xff]  ;;  %v169_v30 = vld [vmem:[#allocation8 + $0x30] sm:$0xff]  ;;  %v168_v31 = vld [vmem:[#allocation8 + $0x28] sm:$0xff] }
  0x1e   :  { %184 = vmatpush.msra.mxu2 %v177_v22  ;;  %v167_v32 = vld [vmem:[#allocation8 + $0x20] sm:$0xff]  ;;  %v166_v33 = vld [vmem:[#allocation8 + $0x18] sm:$0xff]  ;;  %v165_v38 = vld [vmem:[#allocation8 + $0x10] sm:$0xff] }
  0x1f   :  { %147 = vmatpush.msra.mxu1 %v132_v10  ;;  %v231_v34 = vld [vmem:[%s435_s2] ss:$0 sm:$0xff]  ;;  %v164_v39 = vld [vmem:[#allocation8 + $0x8] sm:$0xff]  ;;  %v163_v40 = vld [vmem:[#allocation8] sm:$0xff] }
  0x20   :  { %185 = vmatpush.msra.mxu2 %v176_v23  ;;  %v232_v41 = vld [vmem:[%s437_s4] ss:$0 sm:$0xff] }
  0x21   :  { %148 = vmatpush.msra.mxu1 %v131_v11  ;;  %v233_v45 = vld [vmem:[%s439_s6] ss:$0 sm:$0xff] }
  0x22   :  { %186 = vmatpush.msra.mxu2 %v175_v24 }
  0x23   :  { %149 = vmatpush.msra.mxu1 %v130_v12 }
  0x24   :  { %187 = vmatpush.msra.mxu2 %v174_v25 }
  0x25   :  { %150 = vmatpush.msra.mxu1 %v129_v13 }
  0x26   :  { %188 = vmatpush.msra.mxu2 %v173_v26 }
  0x27   :  { %151 = vmatpush.msra.mxu1 %v128_v14 }
  0x28   :  { %189 = vmatpush.msra.mxu2 %v172_v27 }
  0x29   :  { %152 = vmatpush.msra.mxu1 %v127_v15 }
  0x2a   :  { %190 = vmatpush.msra.mxu2 %v171_v28 }
  0x2b   :  { %153 = vmatpush.msra.mxu1 %v126_v16 }
  0x2c   :  { %191 = vmatpush.msra.mxu2 %v170_v29 }
  0x2d   :  { %154 = vmatpush.msra.mxu1 %v125_v17 }
  0x2e   :  { %192 = vmatpush.msra.mxu2 %v169_v30 }
  0x2f   :  { %155 = vmatpush.msra.mxu1 %v124_v18 }
  0x30   :  { %193 = vmatpush.msra.mxu2 %v168_v31 }
  0x31   :  { %156 = vmatpush.msra.mxu1 %v123_v19 }
  0x32   :  { %194 = vmatpush.msra.mxu2 %v167_v32 }
  0x33   :  { %157 = vmatpush.msra.mxu1 %v122_v20 }
  0x34   :  { %195 = vmatpush.msra.mxu2 %v166_v33 }
  0x36   :  { %196 = vmatpush.msra.mxu2 %v165_v38 }
  0x38   :  { %197 = vmatpush.msra.mxu2 %v164_v39 }
  0x3a   :  { %198 = vmatpush.msra.mxu2 %v163_v40 }
  0x98   :  { %v118_v35 = vpop.f32.mrf.mxu0 }
  0x99   :  { %v119_v36 = vadd.f32 %v231_v34, %v118_v35 }
  0x9b   :  { %v121_v37 = vmax.f32 %v119_v36, 0.0 }
  0x9d   :  { %158 = vmatmul.f32.vlgmr.msra.gmra.mxu1 %v121_v37 }
 0x11a   :  { %v159_v42 = vpop.f32.mrf.mxu1 }
 0x11b   :  { %v160_v43 = vadd.f32 %v232_v41, %v159_v42 }
 0x11d   :  { %v162_v44 = vmax.f32 %v160_v43, 0.0 }
 0x11f   :  { %199 = vmatmul.f32.vlgmr.msra.gmra.mxu2 %v162_v44 }
 0x1a2   :  { %v200_v46 = vpop.f32.mrf.mxu2 }
 0x1a3   :  { %v201_v47 = vadd.f32 %v233_v45, %v200_v46 }
 0x1a5   :  { %203 = vst [vmem:[#allocation10] sm:$0xff] %v201_v47 }
 0x1a6   :  { %214 = dma.vmem_to_hbm [thread:$0]  %s210_s25, 128, %s212_s28, [#allocation4]  }
 0x1a7   :  { %360 = dma.done.wait [#allocation4], 128  }
 0x1a8   :  { %361 = vsyncadd [#allocation4], 4294967168 }
 0x1a9   :  { %219 = vsyncpa [#allocation3], 1 }
 0x1aa   :  { %220 = vsyncpa [#allocation6], 1 }
 0x1ab   :  { %221 = vsyncpa [#allocation9], 1 }
 0x1ac   :  { %222 = vsyncpa [#allocation4], 1 }

</bundles_post_ra>
